<compile_context>
chip_gen: v5e
topology: v5e:2x2
jax: 0.10.0
libtpu: 0.0.40
codegen_flags: <defaults>
</compile_context>

<pallas_src>
import functools

import jax
import jax.numpy as jnp
from jax.experimental import pallas as pl
from jax.experimental.pallas import tpu as pltpu


def _round_up(x: int, m: int) -> int:
    return ((x + m - 1) // m) * m


def _pick_divisor_tile(dim_pad: int, tile_max: int, step: int) -> int:
    """Largest multiple of `step` that is <= tile_max and divides dim_pad."""
    t = max(step, min((tile_max // step) * step, dim_pad))
    while dim_pad % t:
        t -= step
    return t


def text_encoder_kernel(x_ref, w_ref, b_ref, o_ref):
    # One (tb, tn) output tile: f32->bf16 cast fused here (hides under the
    # MXU), MXU matmul with f32 accumulation, bias + ReLU on the VPU, one
    # lane-dense store.
    x = x_ref[...].astype(jnp.bfloat16)                         # [tb, D_in]
    w = w_ref[...]                                              # [D_in, tn] bf16
    acc = jnp.dot(x, w, preferred_element_type=jnp.float32)     # [tb, tn]  f32
    acc = acc + b_ref[...]                                      # [1, tn] broadcast
    o_ref[...] = jnp.maximum(acc, 0.0).astype(o_ref.dtype)


def prepare_text_encoder_params(weight, bias):
    """One-time parameter prep (hoisted out of the per-call path).

    Pads D_hid to a multiple of 128 (lane-dense output tiles), casts W to
    bf16 (MXU operand) and bias to f32 [1, N_pad].
    weight: [D_in, D_hid], bias: [D_hid].
    Returns (w_bf16 [D_in, N_pad], bias_f32 [1, N_pad], d_hid).
    """
    _, d_hid = weight.shape
    n_pad = _round_up(d_hid, 128)
    w_p, b_p = weight, bias
    if n_pad != d_hid:
        w_p = jnp.pad(w_p, ((0, 0), (0, n_pad - d_hid)))
        b_p = jnp.pad(b_p, ((0, n_pad - d_hid),))
    # TODO(synk): on v7x an fp8 weight layout (scale folded into bias/output)
    # would halve weight HBM bytes in the memory-bound regime.
    return (w_p.astype(jnp.bfloat16),
            b_p.astype(jnp.float32).reshape(1, n_pad),
            d_hid)


@functools.partial(jax.jit, static_argnames=("d_hid", "tile_b", "tile_n"))
def text_encoder_apply(x, w_bf16, b_f32, *, d_hid, tile_b=256, tile_n=512):
    """x: [B, D_in] (f32/bf16), w_bf16: [D_in, N_pad], b_f32: [1, N_pad]."""
    B, D_in = x.shape
    N_pad = w_bf16.shape[1]
    out_dtype = x.dtype
    out_itemsize = jnp.dtype(out_dtype).itemsize
    x_itemsize = jnp.dtype(x.dtype).itemsize

    # ---- batch tiling -------------------------------------------------------
    if B <= tile_b:
        # Full-dim block: exempt from the (8,128) rule, no padding op emitted.
        tb, B_pad = B, B
    else:
        tb = _round_up(min(tile_b, B), 16)     # 16: bf16 sublane packing
        B_pad = _round_up(B, tb)

    # ---- hidden-dim tiling (multiple of 128, divides N_pad) ------------------
    tn = _pick_divisor_tile(N_pad, tile_n, 128)

    # Megacore: ensure a parallel axis has >= 2 steps when N allows it so both
    # v7x TensorCores get work (harmless on single-TC v5e/v6e).
    if (B_pad // tb) * (N_pad // tn) < 2 and N_pad >= 256:
        tn = _pick_divisor_tile(N_pad, N_pad // 2, 128)

    # ---- VMEM budget: cap double-buffered working set at ~48 MiB (v7x) ------
    def step_bytes(tn_):
        return 2 * (tb * D_in * x_itemsize        # x tile
                    + D_in * tn_ * 2              # w tile (bf16)
                    + tn_ * 4                     # bias tile (f32)
                    + tb * tn_ * out_itemsize)    # out tile

    VMEM_CAP = 48 * 1024 * 1024
    while step_bytes(tn) > VMEM_CAP and tn > 128:
        tn = _pick_divisor_tile(N_pad, tn - 128, 128)
    # TODO(synk): if even tn=128 exceeds the cap (very large D_in), add a
    # K-reduction grid axis (f32 VMEM accumulator + pl.when init/store, K last
    # and "arbitrary") instead of raising vmem_limit toward physical.

    bytes_per_step = step_bytes(tn)
    # v5e default scoped VMEM is 16 MiB (v6e/v7x: 32 MiB); raise explicitly as
    # soon as we leave the always-safe zone. Capped well under v7x's 64 MiB.
    vmem_limit = None
    if bytes_per_step > 14 * 1024 * 1024:
        vmem_limit = min(bytes_per_step + (2 << 20), 56 * 1024 * 1024)

    num_n_tiles = N_pad // tn
    num_b_tiles = B_pad // tb
    # Outer axis = N tiles: weight block index is constant along the inner
    # (batch) axis, so W streams from HBM exactly once; x re-streams
    # num_n_tiles times (it is the smaller per-tile operand).
    grid = (num_n_tiles, num_b_tiles)

    cost = pl.CostEstimate(
        flops=2 * B_pad * D_in * N_pad,
        transcendentals=0,
        bytes_accessed=(num_n_tiles * B_pad * D_in * x_itemsize  # x, re-streamed
                        + D_in * N_pad * 2                       # W, once
                        + N_pad * 4                              # bias, once
                        + B_pad * N_pad * out_itemsize),         # out, once
    )

    if B_pad != B:
        x = jnp.pad(x, ((0, B_pad - B), (0, 0)))

    out_padded = pl.pallas_call(
        text_encoder_kernel,
        out_shape=jax.ShapeDtypeStruct((B_pad, N_pad), out_dtype),
        grid_spec=pltpu.PrefetchScalarGridSpec(
            num_scalar_prefetch=0,
            grid=grid,
            in_specs=[
                pl.BlockSpec((tb, D_in), lambda j, i: (i, 0)),   # x batch tile
                pl.BlockSpec((D_in, tn), lambda j, i: (0, j)),   # weight N tile
                pl.BlockSpec((1, tn), lambda j, i: (0, j)),      # bias N tile
            ],
            out_specs=pl.BlockSpec((tb, tn), lambda j, i: (i, j)),
        ),
        compiler_params=pltpu.CompilerParams(
            dimension_semantics=("parallel", "parallel"),
            vmem_limit_bytes=vmem_limit,
        ),
        cost_estimate=cost,
    )(x, w_bf16, b_f32)

    # Padded rows/cols hold relu(bias); never consume out_padded directly.
    return out_padded[:B, :d_hid]


def text_encoder(text_features, weight, bias, *, tile_b=256, tile_n=512):
    """Convenience one-shot path. weight: [D_in, D_hid], bias: [D_hid]."""
    w_bf16, b_f32, d_hid = prepare_text_encoder_params(weight, bias)
    return text_encoder_apply(text_features, w_bf16, b_f32,
                              d_hid=d_hid, tile_b=tile_b, tile_n=tile_n)


if __name__ == "__main__":
    key = jax.random.PRNGKey(0)
    k_x, k_w, k_b = jax.random.split(key, 3)

    batch = 8
    text_input_dim = 32
    text_hidden_dim = 64

    x = jax.random.normal(k_x, (batch, text_input_dim), dtype=jnp.float32)
    # nn.Linear(text_input_dim, text_hidden_dim) parameters, stored
    # pre-transposed as W^T: [D_in, D_hid].
    w = jax.random.normal(k_w, (text_input_dim, text_hidden_dim),
                          dtype=jnp.float32) * 0.05
    b = jax.random.normal(k_b, (text_hidden_dim,), dtype=jnp.float32) * 0.05

    # One-time parameter prep (hoisted out of the per-call path).
    w_bf16, b_f32, d_hid = prepare_text_encoder_params(w, b)
    w_bf16, b_f32 = jax.block_until_ready((w_bf16, b_f32))

    out = text_encoder_apply(x, w_bf16, b_f32, d_hid=d_hid)
    out = jax.block_until_ready(out)

    # Reference (plain JAX) with the same bf16-operand / f32-accumulate recipe.
    ref = jnp.maximum(
        jnp.dot(x.astype(jnp.bfloat16), w.astype(jnp.bfloat16),
                preferred_element_type=jnp.float32) + b,
        0.0,
    ).astype(x.dtype)

    assert out.shape == (batch, text_hidden_dim)
    assert jnp.allclose(out, ref, atol=2e-3, rtol=2e-3), (
        float(jnp.max(jnp.abs(out - ref))))

    print("KERNEL_OK")
</pallas_src>

<mosaic_0001>
module attributes {stable_mosaic.version = 11 : i64} {
  func.func @text_encoder_kernel(%arg0: i32, %arg1: i32, %arg2: memref<8x32xf32, #tpu.memory_space<vmem>>, %arg3: memref<32x128xbf16, #tpu.memory_space<vmem>>, %arg4: memref<1x128xf32, #tpu.memory_space<vmem>>, %arg5: memref<8x128xf32, #tpu.memory_space<vmem>>) attributes {dimension_semantics = [#tpu.dimension_semantics<parallel>, #tpu.dimension_semantics<parallel>], iteration_bounds = array<i64: 1, 1>, scalar_prefetch = 0 : i64, scratch_operands = 0 : i64, tpu.core_type = #tpu.core_type<tc>, window_params = [{transform_indices = @transform_0, window_bounds = array<i64: 8, 32>}, {transform_indices = @transform_1, window_bounds = array<i64: 32, 128>}, {transform_indices = @transform_2, window_bounds = array<i64: 1, 128>}, {transform_indices = @transform_3, window_bounds = array<i64: 8, 128>}]} {
    %c0 = arith.constant 0 : index
    %c0_0 = arith.constant 0 : index
    %0 = vector.load %arg2[%c0, %c0_0] : memref<8x32xf32, #tpu.memory_space<vmem>>, vector<8x32xf32>
    %1 = arith.truncf %0 : vector<8x32xf32> to vector<8x32xbf16>
    %c0_1 = arith.constant 0 : index
    %c0_2 = arith.constant 0 : index
    %2 = vector.load %arg3[%c0_1, %c0_2] : memref<32x128xbf16, #tpu.memory_space<vmem>>, vector<32x128xbf16>
    %cst = arith.constant dense<0.000000e+00> : vector<8x128xf32>
    %3 = tpu.matmul %1, %2, %cst {dimension_numbers = #tpu.dot_dimension_numbers<[1], [0], [0], [1], [0, 0, 1, 1], [], []>} : vector<8x32xbf16>, vector<32x128xbf16>, vector<8x128xf32> -> vector<8x128xf32>
    %c0_3 = arith.constant 0 : index
    %c0_4 = arith.constant 0 : index
    %4 = vector.load %arg4[%c0_3, %c0_4] : memref<1x128xf32, #tpu.memory_space<vmem>>, vector<1x128xf32>
    %5 = vector.broadcast %4 : vector<1x128xf32> to vector<8x128xf32>
    %6 = arith.addf %3, %5 : vector<8x128xf32>
    %cst_5 = arith.constant 0.000000e+00 : f32
    %7 = vector.broadcast %cst_5 : f32 to vector<8x128xf32>
    %8 = arith.maximumf %6, %7 : vector<8x128xf32>
    %c0_6 = arith.constant 0 : index
    %c0_7 = arith.constant 0 : index
    %9 = vector.load %arg5[%c0_6, %c0_7] : memref<8x128xf32, #tpu.memory_space<vmem>>, vector<8x128xf32>
    tpu.vector_store %arg5[%c0_6, %c0_7], %8 {strides = array<i32>} : memref<8x128xf32, #tpu.memory_space<vmem>>, vector<8x128xf32>,
    return
  }
  func.func @transform_0(%arg0: i32, %arg1: i32) -> (i32, i32) {
    %c0_i32 = arith.constant 0 : i32
    %c0_i32_0 = arith.constant 0 : i32
    return %arg1, %c0_i32 : i32, i32
  }
  func.func @transform_1(%arg0: i32, %arg1: i32) -> (i32, i32) {
    %c0_i32 = arith.constant 0 : i32
    %c0_i32_0 = arith.constant 0 : i32
    return %c0_i32, %arg0 : i32, i32
  }
  func.func @transform_2(%arg0: i32, %arg1: i32) -> (i32, i32) {
    %c0_i32 = arith.constant 0 : i32
    %c0_i32_0 = arith.constant 0 : i32
    return %c0_i32, %arg0 : i32, i32
  }
  func.func @transform_3(%arg0: i32, %arg1: i32) -> (i32, i32) {
    %c0_i32 = arith.constant 0 : i32
    return %arg1, %arg0 : i32, i32
  }
}

</mosaic_0001>

<bundles_post_ra>
// kernel: text_encoder_apply.1
= control target key start
LH: loop header
LB: loop body
LE: loop exit
PB: predicated region body
PF: predicated region fallthrough
CT: control target
= control target key end

     0   :  { %8 = vsyncpa [#allocation3], 0  ;;  %s237_s0 = inlined_call_operand.hbm [shape: f32[8,32], index: 0, kind: input, shape index: {}]   ;;  %s238_s1 = inlined_call_operand.hbm [shape: bf16[32,128], index: 1, kind: input, shape index: {}]   ;;  %s239_s2 = inlined_call_operand.vmem [shape: f32[1,128], index: 2, kind: input, shape index: {}]   ;;  %s240_s3 = inlined_call_operand.hbm [shape: f32[8,128], index: 3, kind: output, shape index: {}]  }
   0x1   :  { %9 = vsyncpa [#allocation6], 0 }
   0x2   :  { %10 = vsyncpa [#allocation4], 0  ;;  %s16_s14 = sshll.u32 %s237_s0, 4  ;;  %s200_s15 = smov [#allocation2]   ;;  %s17_s14 = int_to_ptr.hbm [resolvable:$true] %s16_s14 }
   0x3   :  { %s18_s16 = sshll.u32 %s200_s15, 4  ;;  %s26_s19 = sshll.u32 %s238_s1, 4  ;;  %s19_s16 = int_to_ptr.vmem [resolvable:$true] %s18_s16  ;;  %s27_s19 = int_to_ptr.hbm [resolvable:$true] %s26_s19 }
   0x4   :  { %21 = dma.hbm_to_vmem [thread:$0]  %s17_s14, 128, %s19_s16, [#allocation3]  }
   0x5   :  { %s201_s20 = smov [#allocation5]   ;;  %s202_s22 = smov 64  }
   0x6   :  { %s28_s21 = sshll.u32 %s201_s20, 4  ;;  %s203_s23 = smov 4   ;;  %s29_s21 = int_to_ptr.vmem [resolvable:$true] %s28_s21 }
   0x7   :  { %34 = dma.hbm_to_vmem [thread:$0]  %s27_s19, 256, %s29_s21, [#allocation6], %s202_s22, %s202_s22, %s203_s23  }
   0x8   :  { %194 = dma.done.wait [#allocation3], 128  }
   0x9   :  { %195 = vsyncadd [#allocation3], 4294967168 }
   0xa   :  { %196 = dma.done.wait [#allocation6], 256  }
   0xb   :  { %197 = vsyncadd [#allocation6], 4294967040  ;;  %v115_v0 = vld [vmem:[#allocation5 + $0x8] sm:$0xff]  ;;  %v114_v1 = vld [vmem:[#allocation5] sm:$0xff]  ;;  %vm68_vm0 = vcmask 261120   ;;  %s204_s24 = smov [#allocation7]  }
   0xc   :  { %78 = vmatpush.bf16.msra.mxu0 %v115_v0  ;;  %v46_v2 = vld [vmem:[#allocation2] sm:$0xff]  ;;  %s92_s25 = sshll.u32 %s204_s24, 4  ;;  %s94_s28 = sshll.u32 %s240_s3, 4  ;;  %s93_s25 = int_to_ptr.vmem [resolvable:$true] %s92_s25  ;;  %s95_s28 = int_to_ptr.hbm [resolvable:$true] %s94_s28 }
   0xd   :  { %v47_v3 = vpack.c.bf16 %v46_v2, %v46_v2  ;;  %v121_v4 = vld [vmem:[%s239_s2] ss:$0 sm:$0xff] }
  0x10   :  { %79 = vmatpush.bf16.msra.mxu0 %v114_v1 }
  0x13   :  { %113 = vmatmul.msk.bf16.vlgmr.msra.gmra.mxu0 %vm68_vm0, %v47_v3 }
  0x90   :  { %v81_v5 = vpop.f32.mrf.mxu0 }
  0x91   :  { %v82_v6 = vadd.f32 %v121_v4, %v81_v5 }
  0x93   :  { %v85_v7 = vmax.f32 %v82_v6, 0.0 }
  0x95   :  { %86 = vst [vmem:[#allocation7] sm:$0xff] %v85_v7 }
  0x96   :  { %97 = dma.vmem_to_hbm [thread:$0]  %s93_s25, 128, %s95_s28, [#allocation4]  }
  0x98   :  { %v83_v8 = vpop.f32.mrf.mxu0 }
  0x99   :  { %198 = dma.done.wait [#allocation4], 128  }
  0x9a   :  { %199 = vsyncadd [#allocation4], 4294967168 }
  0x9b   :  { %102 = vsyncpa [#allocation3], 1 }
  0x9c   :  { %103 = vsyncpa [#allocation6], 1 }
  0x9d   :  { %104 = vsyncpa [#allocation4], 1 }

</bundles_post_ra>
